<compile_context>
chip_gen: v7x
topology: tpu7x:2x2x1
jax: 0.10.0
libtpu: 0.0.40
codegen_flags: <defaults>
</compile_context>

<pallas_src>
import jax
import jax.numpy as jnp
from jax.experimental import pallas as pl
from jax.experimental.pallas import tpu as pltpu


def _conv_sub_mish_kernel(w_ref, x_ref, b_ref, o_ref):
    """One M-tile per grid step.

    w_ref: (Cout_p, KKC)   weight slab, Cout zero-padded to a multiple of 8
    x_ref: (KKC, TM)       im2col'd inputs, flattened (n,h,w) in the lane dim
    b_ref: (Cout_p, 1)     bias with -(s1+s2) already folded in
    o_ref: (Cout_p, TM)    transposed output tile (lane-dense store)
    """
    # Single contraction-36 MXU matmul, f32 accumulation.
    acc = jnp.dot(w_ref[...], x_ref[...], preferred_element_type=jnp.float32)

    # Bias (subtraction scalars folded in on host).
    acc = acc + b_ref[...]

    # Mish: x * tanh(softplus(x)) = x * ((1+e^x)^2 - 1) / ((1+e^x)^2 + 1)
    # Clamp exp argument: for acc >= 30 the ratio is exactly 1.0 in f32.
    t = 1.0 + jnp.exp(jnp.minimum(acc, 30.0))
    tt = t * t
    o_ref[...] = acc * ((tt - 1.0) / (tt + 1.0))


def _round_up(x, m):
    return (x + m - 1) // m * m


@jax.jit
def conv_subtract_mish(x, weight, bias, subtract_value_1, subtract_value_2):
    """x: (N, Cin, H, W) f32; weight: (Cout, Cin, K, K); bias: (Cout,)."""
    N, Cin, H, W = x.shape
    Cout, _, K, _ = weight.shape
    Hout, Wout = H - K + 1, W - K + 1

    M = N * Hout * Wout          # flattened (n, h, w) output positions
    KKC = K * K * Cin            # contraction length (taps x channels)

    TM = 256                     # lane tile (multiple of 128 -> unmasked vst)
    num_tiles = pl.cdiv(M, TM)
    M_pad = num_tiles * TM
    Cout_p = _round_up(Cout, 8)  # sublane-aligned output channels

    # ---- host glue: im2col (transposed), weight slab, effective bias ------
    # lhs_T[(i*K+j)*Cin + c, n*Hout*Wout + h*Wout + w] = x[n, c, h+i, w+j]
    xc = jnp.transpose(x, (1, 0, 2, 3)).astype(jnp.float32)   # (Cin, N, H, W)
    taps = [xc[:, :, i:i + Hout, j:j + Wout].reshape(Cin, M)
            for i in range(K) for j in range(K)]
    lhs_t = jnp.concatenate(taps, axis=0)                     # (KKC, M)
    lhs_t = jnp.pad(lhs_t, ((0, 0), (0, M_pad - M)))

    # w_T[o, (i*K+j)*Cin + c] = weight[o, c, i, j]
    w_t = jnp.transpose(weight, (0, 2, 3, 1)).astype(jnp.float32)
    w_t = w_t.reshape(Cout, KKC)
    w_t = jnp.pad(w_t, ((0, Cout_p - Cout), (0, 0)))

    # Fold both scalar subtractions into the bias (kernel never sees them).
    b_eff = bias.astype(jnp.float32) - subtract_value_1 - subtract_value_2
    b_eff = jnp.pad(b_eff, (0, Cout_p - Cout)).reshape(Cout_p, 1)

    out_t = pl.pallas_call(
        _conv_sub_mish_kernel,
        out_shape=jax.ShapeDtypeStruct((Cout_p, M_pad), jnp.float32),
        grid_spec=pltpu.PrefetchScalarGridSpec(
            num_scalar_prefetch=0,
            grid=(num_tiles,),
            in_specs=[
                pl.BlockSpec((Cout_p, KKC), lambda m: (0, 0)),   # weights (resident)
                pl.BlockSpec((KKC, TM), lambda m: (0, m)),       # im2col tile
                pl.BlockSpec((Cout_p, 1), lambda m: (0, 0)),     # bias (resident)
            ],
            out_specs=pl.BlockSpec((Cout_p, TM), lambda m: (0, m)),
        ),
        compiler_params=pltpu.CompilerParams(
            dimension_semantics=("parallel",)),
    )(w_t, lhs_t, b_eff)

    # ---- host glue: drop padding, back to NCHW ----------------------------
    out = out_t[:Cout, :M].reshape(Cout, N, Hout, Wout)
    return jnp.transpose(out, (1, 0, 2, 3))


def reference(x, weight, bias, s1, s2):
    out = jax.lax.conv_general_dilated(
        x, weight, window_strides=(1, 1), padding="VALID",
        dimension_numbers=("NCHW", "OIHW", "NCHW"))
    out = out + bias.reshape(1, -1, 1, 1)
    out = out - s1 - s2
    return out * jnp.tanh(jnp.log1p(jnp.exp(out)))


if __name__ == "__main__":
    key = jax.random.PRNGKey(0)
    kx, kw, kb = jax.random.split(key, 3)

    # Small shapes consistent with the module.
    N, Cin, H, W = 2, 4, 16, 16
    Cout, K = 16, 3
    subtract_value_1 = 0.5
    subtract_value_2 = 0.2

    x = jax.random.normal(kx, (N, Cin, H, W), dtype=jnp.float32)

    # Deterministic Conv2d-style init: U(-bound, bound), bound = 1/sqrt(fan_in)
    fan_in = Cin * K * K
    bound = 1.0 / (fan_in ** 0.5)
    weight = jax.random.uniform(kw, (Cout, Cin, K, K), jnp.float32,
                                minval=-bound, maxval=bound)
    bias = jax.random.uniform(kb, (Cout,), jnp.float32,
                              minval=-bound, maxval=bound)

    out = conv_subtract_mish(x, weight, bias,
                             subtract_value_1, subtract_value_2)
    out = jax.block_until_ready(out)

    ref = reference(x, weight, bias, subtract_value_1, subtract_value_2)
    assert out.shape == (N, Cout, H - K + 1, W - K + 1)
    assert jnp.allclose(out, ref, atol=1e-4, rtol=1e-4), \
        float(jnp.max(jnp.abs(out - ref)))

    print("KERNEL_OK")
</pallas_src>

<mosaic_0001>
module attributes {stable_mosaic.version = 11 : i64} {
  func.func @_conv_sub_mish_kernel(%arg0: i32, %arg1: memref<16x36xf32, #tpu.memory_space<vmem>>, %arg2: memref<36x256xf32, #tpu.memory_space<vmem>>, %arg3: memref<16x1xf32, #tpu.memory_space<vmem>>, %arg4: memref<16x256xf32, #tpu.memory_space<vmem>>) attributes {dimension_semantics = [#tpu.dimension_semantics<parallel>], iteration_bounds = array<i64: 2>, scalar_prefetch = 0 : i64, scratch_operands = 0 : i64, tpu.core_type = #tpu.core_type<tc>, window_params = [{pipeline_mode = #tpu.pipeline_mode<synchronous>, transform_indices = @transform_0, window_bounds = array<i64: 16, 36>}, {transform_indices = @transform_1, window_bounds = array<i64: 36, 256>}, {pipeline_mode = #tpu.pipeline_mode<synchronous>, transform_indices = @transform_2, window_bounds = array<i64: 16, 1>}, {transform_indices = @transform_3, window_bounds = array<i64: 16, 256>}]} {
    %c0 = arith.constant 0 : index
    %c0_0 = arith.constant 0 : index
    %0 = vector.load %arg1[%c0, %c0_0] : memref<16x36xf32, #tpu.memory_space<vmem>>, vector<16x36xf32>
    %c0_1 = arith.constant 0 : index
    %c0_2 = arith.constant 0 : index
    %1 = vector.load %arg2[%c0_1, %c0_2] : memref<36x256xf32, #tpu.memory_space<vmem>>, vector<36x256xf32>
    %cst = arith.constant dense<0.000000e+00> : vector<16x256xf32>
    %2 = tpu.matmul %0, %1, %cst {dimension_numbers = #tpu.dot_dimension_numbers<[1], [0], [0], [1], [0, 0, 1, 1], [], []>} : vector<16x36xf32>, vector<36x256xf32>, vector<16x256xf32> -> vector<16x256xf32>
    %c0_3 = arith.constant 0 : index
    %c0_4 = arith.constant 0 : index
    %3 = vector.load %arg3[%c0_3, %c0_4] : memref<16x1xf32, #tpu.memory_space<vmem>>, vector<16x1xf32>
    %4 = vector.broadcast %3 : vector<16x1xf32> to vector<16x256xf32>
    %5 = arith.addf %2, %4 : vector<16x256xf32>
    %cst_5 = arith.constant 3.000000e+01 : f32
    %6 = vector.broadcast %cst_5 : f32 to vector<16x256xf32>
    %7 = arith.minimumf %5, %6 : vector<16x256xf32>
    %8 = math.exp %7 : vector<16x256xf32>
    %cst_6 = arith.constant 1.000000e+00 : f32
    %9 = vector.broadcast %cst_6 : f32 to vector<16x256xf32>
    %10 = arith.addf %9, %8 : vector<16x256xf32>
    %11 = arith.mulf %10, %10 : vector<16x256xf32>
    %cst_7 = arith.constant 1.000000e+00 : f32
    %12 = vector.broadcast %cst_7 : f32 to vector<16x256xf32>
    %13 = arith.subf %11, %12 : vector<16x256xf32>
    %cst_8 = arith.constant 1.000000e+00 : f32
    %14 = vector.broadcast %cst_8 : f32 to vector<16x256xf32>
    %15 = arith.addf %11, %14 : vector<16x256xf32>
    %16 = arith.divf %13, %15 : vector<16x256xf32>
    %17 = arith.mulf %5, %16 : vector<16x256xf32>
    %c0_9 = arith.constant 0 : index
    %c0_10 = arith.constant 0 : index
    %18 = vector.load %arg4[%c0_9, %c0_10] : memref<16x256xf32, #tpu.memory_space<vmem>>, vector<16x256xf32>
    tpu.vector_store %arg4[%c0_9, %c0_10], %17 {strides = array<i32>} : memref<16x256xf32, #tpu.memory_space<vmem>>, vector<16x256xf32>,
    return
  }
  func.func @transform_0(%arg0: i32) -> (i32, i32) {
    %c0_i32 = arith.constant 0 : i32
    %c0_i32_0 = arith.constant 0 : i32
    %c0_i32_1 = arith.constant 0 : i32
    return %c0_i32, %c0_i32_0 : i32, i32
  }
  func.func @transform_1(%arg0: i32) -> (i32, i32) {
    %c0_i32 = arith.constant 0 : i32
    %c0_i32_0 = arith.constant 0 : i32
    return %c0_i32, %arg0 : i32, i32
  }
  func.func @transform_2(%arg0: i32) -> (i32, i32) {
    %c0_i32 = arith.constant 0 : i32
    %c0_i32_0 = arith.constant 0 : i32
    %c0_i32_1 = arith.constant 0 : i32
    return %c0_i32, %c0_i32_0 : i32, i32
  }
  func.func @transform_3(%arg0: i32) -> (i32, i32) {
    %c0_i32 = arith.constant 0 : i32
    %c0_i32_0 = arith.constant 0 : i32
    return %c0_i32, %arg0 : i32, i32
  }
}

</mosaic_0001>

<bundles_post_ra>
// kernel: conv_subtract_mish.1
= control target key start
LH: loop header
LB: loop body
LE: loop exit
PB: predicated region body
PF: predicated region fallthrough
CT: control target
= control target key end

     0   :  { %s581_s12 = smov 0   ;;  %s583_s13 = smov 0   ;;  %s657_s0 = inlined_call_operand.vmem [shape: f32[16,36], index: 0, kind: input, shape index: {}]   ;;  %s658_s1 = inlined_call_operand.vmem [shape: f32[36,512], index: 1, kind: input, shape index: {}]   ;;  %s659_s2 = inlined_call_operand.vmem [shape: f32[16,1], index: 2, kind: input, shape index: {}]   ;;  %s660_s3 = inlined_call_operand.vmem [shape: f32[16,512], index: 3, kind: output, shape index: {}]  }
   0x1   :  { %s585_s14 = smov 0  }
   0x2 LB: > { %s453_s15 = sadd.s32 4294967295, %s557_s14   ;;  %s598_s16 = sadd.s32 1, %s557_s14   ;;  %s557_s14 = sphi %s585_s14, %s664_s14   ;;  %s553_s13 = sphi %s583_s13, %s663_s13   ;;  %s549_s12 = sphi %s581_s12, %s662_s12  }
   0x3   : > { %s38_s17 = ssub.s32 %s557_s14, %s598_s16  ;;  %s41_s18 = sadd.s32 1, %s553_s13 }
   0x4   : > { %p39_p0 = scmp.eq.s32.totalorder %s38_s17, 0  ;;  %p48_p1 = scmp.ne.s32.totalorder %s553_s13, %s549_s12 }
   0x5   : > { %p49_p2 = scmp.eq.s32.totalorder %s557_s14, 0  ;;  %p99_p3 = scmp.eq.s32.totalorder %s453_s15, 1 }
   0x6   : > { %s609_s19 = scalar_select %p39_p0, %s553_s13, %s41_s18  }
   0x7   : > { %p50_p4 = por %p49_p2, %p48_p1  ;;  %p611_p5 = por %p99_p3, %p48_p1 }
   0x8   : > { %p456_p6 = scmp.ge.s32.totalorder %s557_s14, 2 }
   0xa   : > { %127 = sbr.rel (%p456_p6) target bundleno = 26 (0x1a), region = 24 }
  0x11   : > { %130 = sbr.rel (!%p50_p4) target bundleno = 26 (0x1a), region = 28  ;;  %s132_s21 = sand.u32 (%p50_p4), 1, %s553_s13  }
  0x12   : > { %s474_s22 = sshll.u32 (%p50_p4), %s557_s14, 4  ;;  %s490_s23 = smul.u32 (%p50_p4), 80, %s132_s21 }
  0x13   : > { %s137_s26 = scalar_lea.vmem (%p50_p4), %s658_s1, %s474_s22 }
  0x14   : > { %v150_v0 = vld [vmem:[%s137_s26] sm:$0xff] (%p50_p4)  ;;  %v152_v1 = vld [vmem:[%s137_s26 + $0x8] sm:$0xff] (%p50_p4)  ;;  %s134_s27 = scalar_lea.vmem (%p50_p4), [#allocation2], %s490_s23 }
  0x15   : > { %v154_v2 = vld [vmem:[%s137_s26 + $0x20] sm:$0xff] (%p50_p4)  ;;  %v156_v3 = vld [vmem:[%s137_s26 + $0x28] sm:$0xff] (%p50_p4)  ;;  %151 = vst [vmem:[%s134_s27] sm:$0xff] (%p50_p4), %v150_v0  ;;  %153 = vst [vmem:[%s134_s27 + $0x8] sm:$0xff] (%p50_p4), %v152_v1 }
  0x16   : > { %v158_v4 = vld [vmem:[%s137_s26 + $0x40] sm:$0xff] (%p50_p4)  ;;  %v160_v5 = vld [vmem:[%s137_s26 + $0x48] sm:$0xff] (%p50_p4)  ;;  %155 = vst [vmem:[%s134_s27 + $0x10] sm:$0xff] (%p50_p4), %v154_v2  ;;  %157 = vst [vmem:[%s134_s27 + $0x18] sm:$0xff] (%p50_p4), %v156_v3 }
  0x17   : > { %159 = vst [vmem:[%s134_s27 + $0x20] sm:$0xff] (%p50_p4), %v158_v4  ;;  %161 = vst [vmem:[%s134_s27 + $0x28] sm:$0xff] (%p50_p4), %v160_v5  ;;  %v162_v6 = vld [vmem:[%s137_s26 + $0x60] sm:$0xff] (%p50_p4)  ;;  %v164_v7 = vld [vmem:[%s137_s26 + $0x68] sm:$0xff] (%p50_p4) }
  0x18   : > { %v166_v8 = vld [vmem:[%s137_s26 + $0x80] sm:$0xff]  ;;  %163 = vst [vmem:[%s134_s27 + $0x30] sm:$0xff] %v162_v6  ;;  %165 = vst [vmem:[%s134_s27 + $0x38] sm:$0xff] %v164_v7  ;;  %v168_v9 = vld [vmem:[%s137_s26 + $0x88] sm:$0xff] }
  0x19   : > { %167 = vst [vmem:[%s134_s27 + $0x40] sm:$0xff] %v166_v8  ;;  %169 = vst [vmem:[%s134_s27 + $0x48] sm:$0xff] %v168_v9 }
  0x1a PF: > { %p459_p7 = scmp.ge.s32.totalorder %s557_s14, 1  ;;  %p174_p8 = scmp.lt.s32.totalorder %s557_s14, 3 }
  0x1c   : > { %p175_p9 = pnand %p459_p7, %p174_p8 }
  0x1d   : > { %s181_s28 = sand.u32 (!%p175_p9), 1, %s549_s12   ;;  %v559_v10 = vmov (!%p175_p9), 0.0   ;;  %v217_v11 = vld [vmem:[%s659_s2] sm:$0xff] (!%p175_p9)  ;;  %v560_v12 = vmov (!%p175_p9), 0   ;;  %v218_v24 = vld [vmem:[%s659_s2 + $0x8] sm:$0xff] (!%p175_p9)  ;;  %vm236_vm0 = vcmask (!%p175_p9), 1043456  }
  0x1e   : > { %178 = sbr.rel (%p175_p9) target bundleno = 309 (0x135), region = 51  ;;  %307 = vmatprep.mubr.f32.mxu0 (!%p175_p9), %v559_v10  ;;  %313 = vmatprep.mubr.f32.mxu1 (!%p175_p9), %v559_v10  ;;  %v205_v28 = vld [vmem:[%s657_s0] sm:$0xff] (!%p175_p9)  ;;  %vm229_vm1 = vcmask (!%p175_p9), 293888   ;;  %v206_v29 = vld [vmem:[%s657_s0 + $0x8] sm:$0xff] (!%p175_p9)  ;;  %s460_s17 = sshll.u32 (!%p175_p9), %s181_s28, 5 }
  0x1f   : > { %s491_s29 = smul.u32 (!%p175_p9), 80, %s181_s28  ;;  %518 = vset.pattern.permute.xlu0 (!%p175_p9), %v560_v12  ;;  %s202_s18 = scalar_lea.vmem (!%p175_p9), [#allocation3], %s460_s17 }
  0x20   : > { %221 = vperm.xlu0 (!%p175_p9), %518, %v217_v11  }
  0x21   : > { %s183_s5 = scalar_lea.vmem (!%p175_p9), [#allocation2], %s491_s29 }
  0x22   : > { %v208_v13 = vld [vmem:[%s183_s5 + $0x8] sm:$0xff] (!%p175_p9)  ;;  %v210_v14 = vld [vmem:[%s183_s5 + $0x18] sm:$0xff] (!%p175_p9)  ;;  %v207_v15 = vld [vmem:[%s183_s5] sm:$0xff] (!%p175_p9) }
  0x23   : > { %v476_v16 = vpack.c.bf16 (!%p175_p9), %v210_v14, %v208_v13  ;;  %v209_v17 = vld [vmem:[%s183_s5 + $0x10] sm:$0xff] (!%p175_p9)  ;;  %v212_v18 = vld [vmem:[%s183_s5 + $0x28] sm:$0xff] (!%p175_p9)  ;;  %v214_v19 = vld [vmem:[%s183_s5 + $0x38] sm:$0xff] (!%p175_p9) }
  0x24   : > { %v478_v20 = vpack.c.bf16 (!%p175_p9), %v209_v17, %v207_v15  ;;  %v480_v21 = vpack.c.bf16 (!%p175_p9), %v214_v19, %v212_v18  ;;  %v211_v22 = vld [vmem:[%s183_s5 + $0x20] sm:$0xff] (!%p175_p9)  ;;  %v213_v23 = vld [vmem:[%s183_s5 + $0x30] sm:$0xff] (!%p175_p9)  ;;  %v216_v26 = vld [vmem:[%s183_s5 + $0x48] sm:$0xf] (!%p175_p9)  ;;  %226 = vperm.xlu0 (!%p175_p9), %518, %v218_v24  }
  0x25   : > { %477 = vmatprep.subr.bf16.mxu0 %v476_v16  ;;  %484 = vmatprep.subr.bf16.mxu1 %v476_v16  ;;  %v482_v25 = vpack.c.bf16 %v213_v23, %v211_v22  ;;  %v215_v27 = vld [vmem:[%s183_s5 + $0x40] sm:$0xf]  ;;  %s475_s12 = sshll.u32 (%p611_p5), %s453_s15, 4 }
  0x26   : > { %479 = vmatpush1.bf16.msra.mxu0 %v478_v20  ;;  %487 = vmatpush1.bf16.msra.mxu1 %v478_v20  ;;  %s373_s23 = scalar_lea.vmem (%p611_p5), %s660_s3, %s475_s12 }
  0x27   : > { %481 = vmatprep.subr.bf16.mxu0 %v480_v21  ;;  %485 = vmatprep.subr.bf16.mxu1 %v480_v21 }
  0x2a   : > { %483 = vmatpush1.bf16.msra.mxu0 %v482_v25  ;;  %488 = vmatpush1.bf16.msra.mxu1 %v482_v25 }
  0x2b   : > { %461 = vmatprep.subr.msk.mxu0 %vm236_vm0, %v216_v26  ;;  %486 = vmatprep.subr.msk.mxu1 %vm236_vm0, %v216_v26 }
  0x2e   : > { %462 = vmatpush1.msk.msra.mxu0 %vm236_vm0, %v215_v27  ;;  %489 = vmatpush1.msk.msra.mxu1 %vm236_vm0, %v215_v27 }
  0x2f   : > { %463 = vmatmul.mubr.msk.f32.vlgmr.msra.gmra.mrb[0].mxu0 %vm229_vm1, %v205_v28  ;;  %464 = vmatmul.mubr.msk.f32.vlgmr.msra.gmra.mrb[0].mxu1 %vm229_vm1, %v206_v29 }
  0x9f   : > { %v222_v30 = vpop.permute.xlu0 %221 }
  0xa3   : > { %v227_v31 = vpop.permute.xlu0 %226 }
 0x102   : > { %v309_v32 = vpop.f32.mrb[0].mxu0  ;;  %v315_v33 = vpop.f32.mrb[0].mxu1 }
 0x103   : > { %v310_v34 = vadd.f32 %v309_v32, %v222_v30  ;;  %v316_v35 = vadd.f32 %v315_v33, %v227_v31  ;;  %v311_v36 = vpop.f32.mrb[1].mxu0  ;;  %v317_v37 = vpop.f32.mrb[1].mxu1 }
 0x104   : > { %v312_v38 = vadd.f32 %v311_v36, %v222_v30  ;;  %v318_v39 = vadd.f32 %v317_v37, %v227_v31 }
 0x105   : > { %v320_v40 = vmin.f32 %v310_v34, 30.0  ;;  %v322_v41 = vmin.f32 %v316_v35, 30.0 }
 0x106   : > { %v321_v42 = vmin.f32 %v312_v38, 30.0  ;;  %v323_v43 = vmin.f32 %v318_v39, 30.0 }
 0x107   : > { %v324_v44 = vmul.f32 1.442695, %v320_v40  ;;  %v328_v45 = vmul.f32 1.442695, %v322_v41 }
 0x108   : > { %v326_v46 = vmul.f32 1.442695, %v321_v42  ;;  %v330_v47 = vmul.f32 1.442695, %v323_v43 }
 0x109   : > { %519 = vpow2.f32 %v324_v44 }
 0x10a   : > { %521 = vpow2.f32 %v328_v45 }
 0x10b   : > { %523 = vpow2.f32 %v326_v46 }
 0x10c   : > { %525 = vpow2.f32 %v330_v47 }
 0x113   : > { %v520_v48 = vpop.eup %519 }
 0x114   : > { %v522_v49 = vpop.eup %521  ;;  %v332_v50 = vadd.f32 1.0, %v520_v48 }
 0x115   : > { %v524_v51 = vpop.eup %523  ;;  %v334_v52 = vadd.f32 1.0, %v522_v49 }
 0x116   : > { %v526_v53 = vpop.eup %525  ;;  %v336_v54 = vmul.f32 %v332_v50, %v332_v50  ;;  %v333_v55 = vadd.f32 1.0, %v524_v51 }
 0x117   : > { %v338_v56 = vmul.f32 %v334_v52, %v334_v52  ;;  %v335_v57 = vadd.f32 1.0, %v526_v53 }
 0x118   : > { %v344_v58 = vadd.f32 1.0, %v336_v54  ;;  %v337_v59 = vmul.f32 %v333_v55, %v333_v55  ;;  %v465_v0 = vadd.f32 -1.0, %v336_v54 }
 0x119   : > { %v346_v60 = vadd.f32 1.0, %v338_v56  ;;  %v339_v61 = vmul.f32 %v335_v57, %v335_v57  ;;  %v467_v2 = vadd.f32 -1.0, %v338_v56 }
 0x11a   : > { %527 = vrcp.f32 %v344_v58  ;;  %v345_v62 = vadd.f32 1.0, %v337_v59  ;;  %v466_v5 = vadd.f32 -1.0, %v337_v59 }
 0x11b   : > { %529 = vrcp.f32 %v346_v60  ;;  %v347_v63 = vadd.f32 1.0, %v339_v61  ;;  %v468_v8 = vadd.f32 -1.0, %v339_v61 }
 0x11c   : > { %531 = vrcp.f32 %v345_v62 }
 0x11d   : > { %533 = vrcp.f32 %v347_v63 }
 0x124   : > { %v528_v1 = vpop.eup %527 }
 0x125   : > { %v530_v3 = vpop.eup %529  ;;  %v349_v4 = vmul.f32 %v528_v1, %v465_v0 }
 0x126   : > { %v532_v6 = vpop.eup %531  ;;  %v353_v7 = vmul.f32 %v530_v3, %v467_v2  ;;  %370 = sbr.rel (!%p611_p5) target bundleno = 309 (0x135), region = 59 }
 0x127   : > { %v534_v9 = vpop.eup %533  ;;  %v356_v10 = vmul.f32 %v349_v4, %v310_v34  ;;  %v351_v11 = vmul.f32 %v532_v6, %v466_v5 }
 0x128   : > { %v358_v12 = vmul.f32 %v353_v7, %v316_v35  ;;  %v355_v13 = vmul.f32 %v534_v9, %v468_v8 }
 0x129   : > { %360 = vst [vmem:[%s202_s18] sm:$0xff] %v356_v10  ;;  %v357_v14 = vmul.f32 %v351_v11, %v312_v38 }
 0x12a   : > { %362 = vst [vmem:[%s202_s18 + $0x10] sm:$0xff] %v358_v12  ;;  %v359_v15 = vmul.f32 %v355_v13, %v318_v39 }
 0x12b   : > { %361 = vst [vmem:[%s202_s18 + $0x8] sm:$0xff] %v357_v14 }
 0x12c   : > { %363 = vst [vmem:[%s202_s18 + $0x18] sm:$0xff] %v359_v15 }
 0x130   : > { %v386_v16 = vld [vmem:[%s202_s18] sm:$0xff] }
 0x131   : > { %v390_v18 = vld [vmem:[%s202_s18 + $0x10] sm:$0xff]  ;;  %387 = vst [vmem:[%s373_s23] sm:$0xff] %v386_v16 }
 0x132   : > { %v388_v17 = vld [vmem:[%s202_s18 + $0x8] sm:$0xff]  ;;  %391 = vst [vmem:[%s373_s23 + $0x20] sm:$0xff] %v390_v18 }
 0x133   : > { %v392_v19 = vld [vmem:[%s202_s18 + $0x18] sm:$0xff]  ;;  %389 = vst [vmem:[%s373_s23 + $0x8] sm:$0xff] %v388_v17 }
 0x134   : > { %393 = vst [vmem:[%s373_s23 + $0x28] sm:$0xff] %v392_v19 }
 0x135 PF: > { %p10_p10 = scmp.ge.s32.totalorder %s598_s16, 4   ;;  %s662_s12 = smov %s553_s13 }
 0x136   : > { %s663_s13 = smov %s609_s19  ;;  %s664_s14 = smov %s598_s16 }
 0x137   :  { %12 = sbr.rel (!%p10_p10) target bundleno = 2 (0x2), region = 113 }

</bundles_post_ra>
